<compile_context>
chip_gen: v6e
topology: v6e:2x2x1
jax: 0.10.0
libtpu: 0.0.40
codegen_flags: <defaults>
</compile_context>

<pallas_src>
import jax
import jax.numpy as jnp
import numpy as np
from jax import lax
from jax.experimental import pallas as pl
from jax.experimental.pallas import tpu as pltpu

BERT_HIDDEN = 768  # fixed by the module (mapping.in_features = 768)


def _head_kernel(x_ref, w_ref, b_ref, o_ref):
    # x_ref: [TB, 768]  CLS hidden tile, native dtype (f32, or bf16 pass-through)
    # w_ref: [768, Ep]  transposed Linear weight (bf16 or f32), lane-padded
    # b_ref: [1, Ep]    Linear bias (f32), lane-padded with zeros
    # o_ref: [TB, Ep]   output tile (f32 or bf16)
    # ReLU in the input dtype, then cast in-register to the MXU feed dtype.
    # The monotone cast commutes with ReLU, so numerics match relu-then-cast.
    x = jnp.maximum(x_ref[...], jnp.zeros((), x_ref.dtype)).astype(w_ref.dtype)
    y = jnp.dot(x, w_ref[...], preferred_element_type=jnp.float32)     # MXU, f32 acc
    y = y + b_ref[...]                                                  # bias (f32)
    # F.normalize(p=2, dim=1): y / max(||y||, 1e-12) == y * rsqrt(max(||y||^2, 1e-24))
    sq = jnp.sum(y * y, axis=1, keepdims=True)                          # XLU row reduce
    inv = lax.rsqrt(jnp.maximum(sq, 1e-24))                             # EUP rsqrt
    o_ref[...] = (y * inv).astype(o_ref.dtype)


def _round_up(x, m):
    return ((x + m - 1) // m) * m


def _vmem_need_bytes(tile_b, e_pad, x_isz, w_isz, o_isz):
    """Estimated per-step VMEM data footprint of the pipelined kernel."""
    x_buf = 2 * tile_b * BERT_HIDDEN * x_isz    # double-buffered input tile
    w_buf = BERT_HIDDEN * e_pad * w_isz         # Buffered(1) resident weight
    b_buf = 8 * e_pad * 4                       # bias row (sublane-padded)
    o_buf = 2 * tile_b * e_pad * o_isz          # double-buffered output tile
    return x_buf + w_buf + b_buf + o_buf


# Keep per-step VMEM data under v5e's 16 MiB scoped default (with headroom for
# Mosaic internal scratch); also comfortably inside v7x's 64 MiB physical VMEM.
_VMEM_DATA_BUDGET = 12 * 1024 * 1024


def _choose_tile_b(B, e_pad, x_isz, w_isz, o_isz, granule):
    """Single tile for small B (grid=(1,)); multiples of 256 for large B;
    shrunk until the VMEM budget is met."""
    if B <= 512:
        tb = _round_up(max(B, granule), granule)    # one tile covers the batch
    else:
        tb = 512                                    # full MXU M edge per step
    while tb > granule and _vmem_need_bytes(tb, e_pad, x_isz, w_isz, o_isz) > _VMEM_DATA_BUDGET:
        tb = tb - 256 if tb > 256 else tb - granule
    return max(tb, granule)


def prepare_head_params(w_t, bias, *, use_bf16=True):
    """One-time model setup: lane-pad and cast the Linear weight/bias.

    Hoisted out of the per-call path so W is not re-read/re-written on every
    forward.  Returns (w_prepared [768, E_pad], bias_prepared [1, E_pad] f32,
    embed_size E).
    """
    H, E = w_t.shape
    assert H == BERT_HIDDEN
    e_pad = _round_up(max(E, 128), 128)             # lane-dense, unmasked stores
    w, b = w_t, bias
    if e_pad != E:
        w = jnp.pad(w, ((0, 0), (0, e_pad - E)))    # zero cols don't perturb row norms
        b = jnp.pad(b, ((0, e_pad - E),))
    w = w.astype(jnp.bfloat16 if use_bf16 else jnp.float32)
    b2d = b.astype(jnp.float32).reshape(1, e_pad)
    return w, b2d, E


def bert_text_encoder_head(cls_hidden, w_prepared, b_prepared, embed_size=None,
                           *, tile_b=None, out_dtype=jnp.float32):
    """cls_hidden: [B, 768] (f32 or bf16); w_prepared/b_prepared from
    prepare_head_params().  Returns [B, embed_size] L2-normalized embeddings."""
    B, H = cls_hidden.shape
    assert H == BERT_HIDDEN
    Hw, E_pad = w_prepared.shape
    assert Hw == BERT_HIDDEN and E_pad % 128 == 0
    E = E_pad if embed_size is None else embed_size

    mm_bf16 = w_prepared.dtype == jnp.bfloat16
    granule = 16 if mm_bf16 else 8                  # bf16 packs 16 sublanes / vreg
    x_isz = cls_hidden.dtype.itemsize
    w_isz = w_prepared.dtype.itemsize
    o_isz = np.dtype(out_dtype).itemsize

    if tile_b is None:
        tile_b = _choose_tile_b(B, E_pad, x_isz, w_isz, o_isz, granule)
    else:
        tile_b = _round_up(min(tile_b, max(B, granule)), granule)

    B_pad = _round_up(B, tile_b)
    # x stays in its native dtype; ReLU + downcast happen inside the kernel.
    x = cls_hidden if B_pad == B else jnp.pad(cls_hidden, ((0, B_pad - B), (0, 0)))

    n_tiles = B_pad // tile_b
    need = _vmem_need_bytes(tile_b, E_pad, x_isz, w_isz, o_isz)
    vmem_limit = int(min(max(need + need // 4 + (2 << 20), 16 << 20), 48 << 20))

    cost = pl.CostEstimate(
        flops=2 * B_pad * BERT_HIDDEN * E_pad,
        transcendentals=B_pad,                      # one rsqrt per row
        bytes_accessed=(B_pad * BERT_HIDDEN * x_isz
                        + BERT_HIDDEN * E_pad * w_isz
                        + E_pad * 4
                        + B_pad * E_pad * o_isz),
    )

    out = pl.pallas_call(
        _head_kernel,
        out_shape=jax.ShapeDtypeStruct((B_pad, E_pad), out_dtype),
        grid_spec=pl.GridSpec(
            grid=(n_tiles,),
            in_specs=[
                pl.BlockSpec((tile_b, BERT_HIDDEN), lambda i: (i, 0)),
                # Constant index map -> resident block; one buffer reclaims VMEM.
                pl.BlockSpec((BERT_HIDDEN, E_pad), lambda i: (0, 0),
                             pipeline_mode=pl.Buffered(1)),
                pl.BlockSpec((1, E_pad), lambda i: (0, 0),
                             pipeline_mode=pl.Buffered(1)),
            ],
            out_specs=pl.BlockSpec((tile_b, E_pad), lambda i: (i, 0)),
        ),
        compiler_params=pltpu.CompilerParams(
            dimension_semantics=("parallel",),
            vmem_limit_bytes=vmem_limit),
        cost_estimate=cost,
    )(x, w_prepared, b_prepared)

    # Slice only when padding actually happened (no-op for aligned shapes).
    if B_pad != B:
        out = out[:B]
    if E != E_pad:
        out = out[:, :E]
    return out


def reference_head(cls_hidden, w_t, bias):
    y = jnp.maximum(cls_hidden, 0.0) @ w_t + bias
    n = jnp.sqrt(jnp.sum(y * y, axis=1, keepdims=True))
    return y / jnp.maximum(n, 1e-12)


if __name__ == "__main__":
    embed_size = 128
    batch = 16

    key = jax.random.PRNGKey(0)
    k_x, k_w = jax.random.split(key)

    # Synthetic "last_hidden_state[:, 0, :]" coming out of BERT.
    cls_hidden = jax.random.normal(k_x, (batch, BERT_HIDDEN), dtype=jnp.float32)

    # Deterministic init matching the module's __init__:
    #   r = sqrt(6) / sqrt(in + out); weight ~ U(-r, r); bias = 0
    r = float(np.sqrt(6.0) / np.sqrt(BERT_HIDDEN + embed_size))
    w = jax.random.uniform(k_w, (embed_size, BERT_HIDDEN),
                           minval=-r, maxval=r, dtype=jnp.float32)
    w_t = jnp.transpose(w)                          # [768, embed_size]
    bias = jnp.zeros((embed_size,), dtype=jnp.float32)

    ref = reference_head(cls_hidden, w_t, bias)

    # Exact f32 matmul path: tight tolerance.
    w_f32, b_f32, E_f32 = prepare_head_params(w_t, bias, use_bf16=False)
    out_f32 = jax.block_until_ready(
        bert_text_encoder_head(cls_hidden, w_f32, b_f32, E_f32))
    np.testing.assert_allclose(np.asarray(out_f32), np.asarray(ref),
                               rtol=1e-5, atol=1e-5)

    # Default fast path: bf16 MXU inputs (cast in-kernel), f32 accumulate/epilogue.
    w_bf, b_bf, E_bf = prepare_head_params(w_t, bias, use_bf16=True)
    out_bf = jax.block_until_ready(
        bert_text_encoder_head(cls_hidden, w_bf, b_bf, E_bf))
    np.testing.assert_allclose(np.asarray(out_bf), np.asarray(ref),
                               rtol=2e-2, atol=2e-2)

    # bf16 output writeback path (halves the output HBM stream).
    out_bf_o = jax.block_until_ready(
        bert_text_encoder_head(cls_hidden, w_bf, b_bf, E_bf,
                               out_dtype=jnp.bfloat16))
    np.testing.assert_allclose(np.asarray(out_bf_o.astype(jnp.float32)),
                               np.asarray(ref), rtol=4e-2, atol=4e-2)

    # Odd shapes: batch not a tile-granule multiple, embed_size not lane-aligned.
    e2, b2 = 96, 12
    w2 = jax.random.uniform(jax.random.PRNGKey(1), (e2, BERT_HIDDEN),
                            minval=-r, maxval=r, dtype=jnp.float32)
    w2_t = jnp.transpose(w2)
    bias2 = jnp.zeros((e2,), dtype=jnp.float32)
    x2 = cls_hidden[:b2]
    w2p, b2p, E2 = prepare_head_params(w2_t, bias2, use_bf16=False)
    out2 = jax.block_until_ready(bert_text_encoder_head(x2, w2p, b2p, E2))
    np.testing.assert_allclose(np.asarray(out2),
                               np.asarray(reference_head(x2, w2_t, bias2)),
                               rtol=1e-5, atol=1e-5)

    print("KERNEL_OK")
</pallas_src>

<mosaic_0001>
module attributes {stable_mosaic.version = 11 : i64} {
  func.func @_head_kernel(%arg0: i32, %arg1: memref<16x768xf32, #tpu.memory_space<vmem>>, %arg2: memref<768x128xf32, #tpu.memory_space<vmem>>, %arg3: memref<1x128xf32, #tpu.memory_space<vmem>>, %arg4: memref<16x128xf32, #tpu.memory_space<vmem>>) attributes {dimension_semantics = [#tpu.dimension_semantics<parallel>], iteration_bounds = array<i64: 1>, scalar_prefetch = 0 : i64, scratch_operands = 0 : i64, tpu.core_type = #tpu.core_type<tc>, window_params = [{transform_indices = @transform_0, window_bounds = array<i64: 16, 768>}, {pipeline_mode = #tpu.pipeline_mode<synchronous>, transform_indices = @transform_1, window_bounds = array<i64: 768, 128>}, {pipeline_mode = #tpu.pipeline_mode<synchronous>, transform_indices = @transform_2, window_bounds = array<i64: 1, 128>}, {transform_indices = @transform_3, window_bounds = array<i64: 16, 128>}]} {
    %c0 = arith.constant 0 : index
    %c0_0 = arith.constant 0 : index
    %0 = vector.load %arg1[%c0, %c0_0] : memref<16x768xf32, #tpu.memory_space<vmem>>, vector<16x768xf32>
    %cst = arith.constant 0.000000e+00 : f32
    %1 = vector.broadcast %cst : f32 to vector<16x768xf32>
    %2 = arith.maximumf %0, %1 : vector<16x768xf32>
    %c0_1 = arith.constant 0 : index
    %c0_2 = arith.constant 0 : index
    %3 = vector.load %arg2[%c0_1, %c0_2] : memref<768x128xf32, #tpu.memory_space<vmem>>, vector<768x128xf32>
    %cst_3 = arith.constant dense<0.000000e+00> : vector<16x128xf32>
    %4 = tpu.matmul %2, %3, %cst_3 {dimension_numbers = #tpu.dot_dimension_numbers<[1], [0], [0], [1], [0, 0, 1, 1], [], []>} : vector<16x768xf32>, vector<768x128xf32>, vector<16x128xf32> -> vector<16x128xf32>
    %c0_4 = arith.constant 0 : index
    %c0_5 = arith.constant 0 : index
    %5 = vector.load %arg3[%c0_4, %c0_5] : memref<1x128xf32, #tpu.memory_space<vmem>>, vector<1x128xf32>
    %6 = vector.broadcast %5 : vector<1x128xf32> to vector<16x128xf32>
    %7 = arith.addf %4, %6 : vector<16x128xf32>
    %8 = arith.mulf %7, %7 : vector<16x128xf32>
    %cst_6 = arith.constant dense<0.000000e+00> : vector<16xf32>
    %9 = vector.multi_reduction <add>, %8, %cst_6 [1] : vector<16x128xf32> to vector<16xf32>
    %10 = vector.shape_cast %9 : vector<16xf32> to vector<16x1xf32>
    %cst_7 = arith.constant 1.000000e-24 : f32
    %11 = vector.broadcast %cst_7 : f32 to vector<16x1xf32>
    %12 = arith.maximumf %10, %11 : vector<16x1xf32>
    %13 = math.rsqrt %12 : vector<16x1xf32>
    %14 = vector.broadcast %13 : vector<16x1xf32> to vector<16x128xf32>
    %15 = arith.mulf %7, %14 : vector<16x128xf32>
    %c0_8 = arith.constant 0 : index
    %c0_9 = arith.constant 0 : index
    %16 = vector.load %arg4[%c0_8, %c0_9] : memref<16x128xf32, #tpu.memory_space<vmem>>, vector<16x128xf32>
    tpu.vector_store %arg4[%c0_8, %c0_9], %15 {strides = array<i32>} : memref<16x128xf32, #tpu.memory_space<vmem>>, vector<16x128xf32>,
    return
  }
  func.func @transform_0(%arg0: i32) -> (i32, i32) {
    %c0_i32 = arith.constant 0 : i32
    %c0_i32_0 = arith.constant 0 : i32
    return %arg0, %c0_i32 : i32, i32
  }
  func.func @transform_1(%arg0: i32) -> (i32, i32) {
    %c0_i32 = arith.constant 0 : i32
    %c0_i32_0 = arith.constant 0 : i32
    %c0_i32_1 = arith.constant 0 : i32
    return %c0_i32, %c0_i32_0 : i32, i32
  }
  func.func @transform_2(%arg0: i32) -> (i32, i32) {
    %c0_i32 = arith.constant 0 : i32
    %c0_i32_0 = arith.constant 0 : i32
    %c0_i32_1 = arith.constant 0 : i32
    return %c0_i32, %c0_i32_0 : i32, i32
  }
  func.func @transform_3(%arg0: i32) -> (i32, i32) {
    %c0_i32 = arith.constant 0 : i32
    %c0_i32_0 = arith.constant 0 : i32
    return %arg0, %c0_i32 : i32, i32
  }
}

</mosaic_0001>

<bundles_post_ra>
// kernel: tpu_custom_call.1
= control target key start
LH: loop header
LB: loop body
LE: loop exit
PB: predicated region body
PF: predicated region fallthrough
CT: control target
= control target key end

     0   :  { %8 = vsyncpa [#allocation3], 0  ;;  %s696_s0 = inlined_call_operand.hbm [shape: f32[16,768], index: 0, kind: input, shape index: {}]   ;;  %s697_s1 = inlined_call_operand.hbm [shape: f32[768,128], index: 1, kind: input, shape index: {}]   ;;  %s698_s2 = inlined_call_operand.vmem [shape: f32[1,128], index: 2, kind: input, shape index: {}]   ;;  %s699_s3 = inlined_call_operand.hbm [shape: f32[16,128], index: 3, kind: output, shape index: {}]  }
   0x1   :  { %9 = vsyncpa [#allocation6], 0 }
   0x2   :  { %10 = vsyncpa [#allocation4], 0  ;;  %s651_s12 = smov [#allocation2]  }
   0x3   :  { %s16_s13 = sshll.u32 %s651_s12, 4  ;;  %s17_s13 = int_to_ptr.vmem [resolvable:$true] %s16_s13 }
   0x4   :  { %s593_s14 = scalar_lea.vmem %s17_s13, 1536  ;;  %p598_p1 = scmp.lt.s32.totalorder %s17_s13, %s17_s13 }
   0x5   :  { %p594_p0 = scmp.ne.s32.totalorder %s17_s13, %s593_s14  ;;  %p599_p2 = scmp.lt.s32.totalorder %s593_s14, %s593_s14 }
   0x7   :  { %p600_p3 = por %p599_p2, %p598_p1 }
   0x9   :  { %p601_p4 = pnand %p600_p3, %p594_p0 }
   0xb   :  { %604 = shalt.err (!%p601_p4)
}
   0xc   :  { %s652_s15 = smov 768   ;;  %s653_s16 = smov 48  }
   0xd   :  { %22 = dma.hbm_to_vmem [thread:$0]  %s696_s0, 1536, %s17_s13, [#allocation3], %s652_s15, %s652_s15, %s653_s16  }
   0xe   :  { %s654_s19 = smov [#allocation5]  }
   0xf   :  { %s28_s20 = sshll.u32 %s654_s19, 4  ;;  %s29_s20 = int_to_ptr.vmem [resolvable:$true] %s28_s20 }
  0x10   :  { %s613_s21 = scalar_lea.vmem %s29_s20, 12288  ;;  %p618_p6 = scmp.lt.s32.totalorder %s29_s20, %s29_s20 }
  0x11   :  { %p614_p5 = scmp.ne.s32.totalorder %s29_s20, %s613_s21  ;;  %p619_p7 = scmp.lt.s32.totalorder %s613_s21, %s613_s21 }
  0x13   :  { %p620_p8 = por %p619_p7, %p618_p6 }
  0x15   :  { %p621_p9 = pnand %p620_p8, %p614_p5 }
  0x17   :  { %624 = shalt.err (!%p621_p9)
}
  0x18   :  { %s655_s22 = smov 128   ;;  %s656_s23 = smov 8  }
  0x19   :  { %34 = dma.hbm_to_vmem [thread:$0]  %s697_s1, 12288, %s29_s20, [#allocation6], %s655_s22, %s655_s22, %s656_s23  }
  0x1a   :  { %645 = dma.done.wait [#allocation3], 1536  }
  0x1b   :  { %646 = vsyncadd [#allocation3], 4294965760 }
  0x1c   :  { %647 = dma.done.wait [#allocation6], 12288  }
  0x1d   :  { %648 = vsyncadd [#allocation6], 4294955008  ;;  %v98_v0 = vld [vmem:[#allocation5 + $0xf8] sm:$0xff]  ;;  %v97_v4 = vld [vmem:[#allocation5 + $0xf0] sm:$0xff] }
  0x1e   :  { %v130_v1 = vld [vmem:[#allocation5 + $0x1f8] sm:$0xff]  ;;  %428 = vmatprep.subr.mxu0 %v98_v0  ;;  %v129_v5 = vld [vmem:[#allocation5 + $0x1f0] sm:$0xff]  ;;  %v96_v8 = vld [vmem:[#allocation5 + $0xe8] sm:$0xff] }
  0x1f   :  { %v82_v2 = vld [vmem:[#allocation5 + $0x78] sm:$0xff]  ;;  %466 = vmatprep.subr.mxu1 %v130_v1  ;;  %v81_v6 = vld [vmem:[#allocation5 + $0x70] sm:$0xff]  ;;  %v128_v9 = vld [vmem:[#allocation5 + $0x1e8] sm:$0xff] }
  0x20   :  { %v114_v3 = vld [vmem:[#allocation5 + $0x178] sm:$0xff]  ;;  %429 = vmatpush3.msra.mxu0 %v82_v2  ;;  %v113_v7 = vld [vmem:[#allocation5 + $0x170] sm:$0xff]  ;;  %v80_v10 = vld [vmem:[#allocation5 + $0x68] sm:$0xff] }
  0x21   :  { %467 = vmatpush3.msra.mxu1 %v114_v3  ;;  %430 = vmatprep.subr.mxu0 %v97_v4  ;;  %v112_v11 = vld [vmem:[#allocation5 + $0x168] sm:$0xff]  ;;  %v95_v12 = vld [vmem:[#allocation5 + $0xe0] sm:$0xff]  ;;  %v94_v16 = vld [vmem:[#allocation5 + $0xd8] sm:$0xff] }
  0x22   :  { %468 = vmatprep.subr.mxu1 %v129_v5  ;;  %431 = vmatpush3.msra.mxu0 %v81_v6  ;;  %v127_v13 = vld [vmem:[#allocation5 + $0x1e0] sm:$0xff]  ;;  %v126_v17 = vld [vmem:[#allocation5 + $0x1d8] sm:$0xff]  ;;  %v93_v20 = vld [vmem:[#allocation5 + $0xd0] sm:$0xff] }
  0x23   :  { %469 = vmatpush3.msra.mxu1 %v113_v7  ;;  %432 = vmatprep.subr.mxu0 %v96_v8  ;;  %v79_v14 = vld [vmem:[#allocation5 + $0x60] sm:$0xff]  ;;  %v78_v18 = vld [vmem:[#allocation5 + $0x58] sm:$0xff]  ;;  %v125_v21 = vld [vmem:[#allocation5 + $0x1d0] sm:$0xff] }
  0x24   :  { %470 = vmatprep.subr.mxu1 %v128_v9  ;;  %v111_v15 = vld [vmem:[#allocation5 + $0x160] sm:$0xff]  ;;  %433 = vmatpush3.msra.mxu0 %v80_v10  ;;  %v110_v19 = vld [vmem:[#allocation5 + $0x158] sm:$0xff]  ;;  %v77_v22 = vld [vmem:[#allocation5 + $0x50] sm:$0xff] }
  0x25   :  { %471 = vmatpush3.msra.mxu1 %v112_v11  ;;  %434 = vmatprep.subr.mxu0 %v95_v12  ;;  %v109_v23 = vld [vmem:[#allocation5 + $0x150] sm:$0xff]  ;;  %v92_v24 = vld [vmem:[#allocation5 + $0xc8] sm:$0xff]  ;;  %v91_v28 = vld [vmem:[#allocation5 + $0xc0] sm:$0xff] }
  0x26   :  { %472 = vmatprep.subr.mxu1 %v127_v13  ;;  %435 = vmatpush3.msra.mxu0 %v79_v14  ;;  %v124_v25 = vld [vmem:[#allocation5 + $0x1c8] sm:$0xff]  ;;  %v123_v29 = vld [vmem:[#allocation5 + $0x1c0] sm:$0xff]  ;;  %v90_v32 = vld [vmem:[#allocation5 + $0xb8] sm:$0xff] }
  0x27   :  { %473 = vmatpush3.msra.mxu1 %v111_v15  ;;  %436 = vmatprep.subr.mxu0 %v94_v16  ;;  %v76_v26 = vld [vmem:[#allocation5 + $0x48] sm:$0xff]  ;;  %v75_v30 = vld [vmem:[#allocation5 + $0x40] sm:$0xff]  ;;  %v122_v33 = vld [vmem:[#allocation5 + $0x1b8] sm:$0xff] }
  0x28   :  { %474 = vmatprep.subr.mxu1 %v126_v17  ;;  %437 = vmatpush3.msra.mxu0 %v78_v18  ;;  %v108_v27 = vld [vmem:[#allocation5 + $0x148] sm:$0xff]  ;;  %v107_v31 = vld [vmem:[#allocation5 + $0x140] sm:$0xff]  ;;  %v74_v34 = vld [vmem:[#allocation5 + $0x38] sm:$0xff] }
  0x29   :  { %475 = vmatpush3.msra.mxu1 %v110_v19  ;;  %438 = vmatprep.subr.mxu0 %v93_v20  ;;  %v106_v35 = vld [vmem:[#allocation5 + $0x138] sm:$0xff]  ;;  %v89_v36 = vld [vmem:[#allocation5 + $0xb0] sm:$0xff]  ;;  %v88_v40 = vld [vmem:[#allocation5 + $0xa8] sm:$0xff] }
  0x2a   :  { %476 = vmatprep.subr.mxu1 %v125_v21  ;;  %439 = vmatpush3.msra.mxu0 %v77_v22  ;;  %v121_v37 = vld [vmem:[#allocation5 + $0x1b0] sm:$0xff]  ;;  %v120_v41 = vld [vmem:[#allocation5 + $0x1a8] sm:$0xff]  ;;  %v87_v44 = vld [vmem:[#allocation5 + $0xa0] sm:$0xff] }
  0x2b   :  { %477 = vmatpush3.msra.mxu1 %v109_v23  ;;  %440 = vmatprep.subr.mxu0 %v92_v24  ;;  %v73_v38 = vld [vmem:[#allocation5 + $0x30] sm:$0xff]  ;;  %v72_v42 = vld [vmem:[#allocation5 + $0x28] sm:$0xff]  ;;  %v119_v45 = vld [vmem:[#allocation5 + $0x1a0] sm:$0xff] }
  0x2c   :  { %478 = vmatprep.subr.mxu1 %v124_v25  ;;  %441 = vmatpush3.msra.mxu0 %v76_v26  ;;  %v105_v39 = vld [vmem:[#allocation5 + $0x130] sm:$0xff]  ;;  %v104_v43 = vld [vmem:[#allocation5 + $0x128] sm:$0xff]  ;;  %v71_v46 = vld [vmem:[#allocation5 + $0x20] sm:$0xff] }
  0x2d   :  { %479 = vmatpush3.msra.mxu1 %v108_v27  ;;  %442 = vmatprep.subr.mxu0 %v91_v28  ;;  %v103_v47 = vld [vmem:[#allocation5 + $0x120] sm:$0xff]  ;;  %v86_v48 = vld [vmem:[#allocation5 + $0x98] sm:$0xff]  ;;  %v85_v52 = vld [vmem:[#allocation5 + $0x90] sm:$0xff] }
  0x2e   :  { %480 = vmatprep.subr.mxu1 %v123_v29  ;;  %443 = vmatpush3.msra.mxu0 %v75_v30  ;;  %v118_v49 = vld [vmem:[#allocation5 + $0x198] sm:$0xff]  ;;  %v117_v53 = vld [vmem:[#allocation5 + $0x190] sm:$0xff]  ;;  %v44_v56 = vld [vmem:[#allocation2 + $0x8] sm:$0xff] }
  0x2f   :  { %481 = vmatpush3.msra.mxu1 %v107_v31  ;;  %444 = vmatprep.subr.mxu0 %v90_v32  ;;  %v70_v50 = vld [vmem:[#allocation5 + $0x18] sm:$0xff]  ;;  %v69_v54 = vld [vmem:[#allocation5 + $0x10] sm:$0xff]  ;;  %v84_v57 = vld [vmem:[#allocation5 + $0x88] sm:$0xff]  ;;  %v56_v1 = vmax.f32 %v44_v56, 0.0 }
  0x30   :  { %482 = vmatprep.subr.mxu1 %v122_v33  ;;  %445 = vmatpush3.msra.mxu0 %v74_v34  ;;  %v102_v51 = vld [vmem:[#allocation5 + $0x118] sm:$0xff]  ;;  %v101_v55 = vld [vmem:[#allocation5 + $0x110] sm:$0xff]  ;;  %v116_v58 = vld [vmem:[#allocation5 + $0x188] sm:$0xff] }
  0x31   :  { %483 = vmatpush3.msra.mxu1 %v106_v35  ;;  %446 = vmatprep.subr.mxu0 %v89_v36  ;;  %v43_v59 = vld [vmem:[#allocation2] sm:$0xff]  ;;  %v68_v60 = vld [vmem:[#allocation5 + $0x8] sm:$0xff]  ;;  %v46_v62 = vld [vmem:[#allocation2 + $0x18] sm:$0xff] }
  0x32   :  { %484 = vmatprep.subr.mxu1 %v121_v37  ;;  %447 = vmatpush3.msra.mxu0 %v73_v38  ;;  %v100_v61 = vld [vmem:[#allocation5 + $0x108] sm:$0xff]  ;;  %v83_v63 = vld [vmem:[#allocation5 + $0x80] sm:$0xff]  ;;  %v45_v2 = vld [vmem:[#allocation2 + $0x10] sm:$0xff]  ;;  %v55_v4 = vmax.f32 %v43_v59, 0.0  ;;  %v58_v6 = vmax.f32 %v46_v62, 0.0 }
  0x33   :  { %485 = vmatpush3.msra.mxu1 %v105_v39  ;;  %448 = vmatprep.subr.mxu0 %v88_v40  ;;  %v115_v0 = vld [vmem:[#allocation5 + $0x180] sm:$0xff]  ;;  %v162_v7 = vld [vmem:[#allocation5 + $0x2f8] sm:$0xff]  ;;  %v57_v8 = vmax.f32 %v45_v2, 0.0  ;;  %v161_v10 = vld [vmem:[#allocation5 + $0x2f0] sm:$0xff] }
  0x34   :  { %486 = vmatprep.subr.mxu1 %v120_v41  ;;  %449 = vmatpush3.msra.mxu0 %v72_v42  ;;  %v67_v3 = vld [vmem:[#allocation5] sm:$0xff]  ;;  %v146_v9 = vld [vmem:[#allocation5 + $0x278] sm:$0xff]  ;;  %v145_v11 = vld [vmem:[#allocation5 + $0x270] sm:$0xff] }
  0x35   :  { %487 = vmatpush3.msra.mxu1 %v104_v43  ;;  %450 = vmatprep.subr.mxu0 %v87_v44  ;;  %v99_v5 = vld [vmem:[#allocation5 + $0x100] sm:$0xff]  ;;  %v160_v12 = vld [vmem:[#allocation5 + $0x2e8] sm:$0xff]  ;;  %v158_v16 = vld [vmem:[#allocation5 + $0x2d8] sm:$0xff] }
  0x36   :  { %488 = vmatprep.subr.mxu1 %v119_v45  ;;  %451 = vmatpush3.msra.mxu0 %v71_v46  ;;  %v144_v13 = vld [vmem:[#allocation5 + $0x268] sm:$0xff]  ;;  %v159_v14 = vld [vmem:[#allocation5 + $0x2e0] sm:$0xff]  ;;  %v142_v17 = vld [vmem:[#allocation5 + $0x258] sm:$0xff] }
  0x37   :  { %489 = vmatpush3.msra.mxu1 %v103_v47  ;;  %452 = vmatprep.subr.mxu0 %v86_v48  ;;  %v143_v15 = vld [vmem:[#allocation5 + $0x260] sm:$0xff]  ;;  %v157_v18 = vld [vmem:[#allocation5 + $0x2d0] sm:$0xff]  ;;  %v156_v20 = vld [vmem:[#allocation5 + $0x2c8] sm:$0xff] }
  0x38   :  { %490 = vmatprep.subr.mxu1 %v118_v49  ;;  %453 = vmatpush3.msra.mxu0 %v70_v50  ;;  %v141_v19 = vld [vmem:[#allocation5 + $0x250] sm:$0xff]  ;;  %v140_v21 = vld [vmem:[#allocation5 + $0x248] sm:$0xff]  ;;  %v155_v22 = vld [vmem:[#allocation5 + $0x2c0] sm:$0xff] }
  0x39   :  { %491 = vmatpush3.msra.mxu1 %v102_v51  ;;  %454 = vmatprep.subr.mxu0 %v85_v52  ;;  %v139_v23 = vld [vmem:[#allocation5 + $0x240] sm:$0xff]  ;;  %v154_v24 = vld [vmem:[#allocation5 + $0x2b8] sm:$0xff]  ;;  %v153_v26 = vld [vmem:[#allocation5 + $0x2b0] sm:$0xff] }
  0x3a   :  { %492 = vmatprep.subr.mxu1 %v117_v53  ;;  %455 = vmatpush3.msra.mxu0 %v69_v54  ;;  %v138_v25 = vld [vmem:[#allocation5 + $0x238] sm:$0xff]  ;;  %v137_v27 = vld [vmem:[#allocation5 + $0x230] sm:$0xff]  ;;  %v152_v28 = vld [vmem:[#allocation5 + $0x2a8] sm:$0xff] }
  0x3b   :  { %493 = vmatpush3.msra.mxu1 %v101_v55  ;;  %456 = vmatprep.subr.mxu0 %v84_v57  ;;  %v136_v29 = vld [vmem:[#allocation5 + $0x228] sm:$0xff]  ;;  %v50_v30 = vld [vmem:[#allocation2 + $0x38] sm:$0xff]  ;;  %v151_v31 = vld [vmem:[#allocation5 + $0x2a0] sm:$0xff] }
  0x3c   :  { %494 = vmatprep.subr.mxu1 %v116_v58  ;;  %457 = vmatpush3.msra.mxu0 %v68_v60  ;;  %v49_v32 = vld [vmem:[#allocation2 + $0x30] sm:$0xff]  ;;  %v135_v33 = vld [vmem:[#allocation5 + $0x220] sm:$0xff]  ;;  %v150_v34 = vld [vmem:[#allocation5 + $0x298] sm:$0xff]  ;;  %v62_v35 = vmax.f32 %v50_v30, 0.0 }
  0x3d   :  { %495 = vmatpush3.msra.mxu1 %v100_v61  ;;  %458 = vmatprep.subr.mxu0 %v83_v63  ;;  %v52_v36 = vld [vmem:[#allocation2 + $0x48] sm:$0xff]  ;;  %v134_v37 = vld [vmem:[#allocation5 + $0x218] sm:$0xff]  ;;  %v61_v38 = vmax.f32 %v49_v32, 0.0  ;;  %v51_v39 = vld [vmem:[#allocation2 + $0x40] sm:$0xff] }
  0x3e   :  { %496 = vmatprep.subr.mxu1 %v115_v0  ;;  %459 = vmatpush3.msra.mxu0 %v67_v3  ;;  %v149_v40 = vld [vmem:[#allocation5 + $0x290] sm:$0xff]  ;;  %v64_v41 = vmax.f32 %v52_v36, 0.0  ;;  %v63_v43 = vmax.f32 %v51_v39, 0.0  ;;  %v148_v44 = vld [vmem:[#allocation5 + $0x288] sm:$0xff]  ;;  %v54_v46 = vld [vmem:[#allocation2 + $0x58] sm:$0xff] }
  0x3f   :  { %234 = vmatprep.mubr.f32.mxu0 %v56_v1  ;;  %497 = vmatpush3.msra.mxu1 %v99_v5  ;;  %v133_v42 = vld [vmem:[#allocation5 + $0x210] sm:$0xff]  ;;  %v48_v45 = vld [vmem:[#allocation2 + $0x28] sm:$0xff]  ;;  %v47_v48 = vld [vmem:[#allocation2 + $0x20] sm:$0xff]  ;;  %v66_v53 = vmax.f32 %v54_v46, 0.0 }
  0x40   :  { %235 = vmatmul.mubr.f32.vlgmr.msra.gmra.mxu0 %v55_v4  ;;  %309 = vmatprep.mubr.f32.mxu1 %v58_v6  ;;  %v132_v47 = vld [vmem:[#allocation5 + $0x208] sm:$0xff]  ;;  %v53_v49 = vld [vmem:[#allocation2 + $0x50] sm:$0xff]  ;;  %v147_v50 = vld [vmem:[#allocation5 + $0x280] sm:$0xff]  ;;  %v60_v52 = vmax.f32 %v48_v45, 0.0  ;;  %v59_v54 = vmax.f32 %v47_v48, 0.0 }
  0x41   :  { %504 = vmatprep.subr.mxu0 %v162_v7  ;;  %542 = vmatprep.subr.mxu1 %v162_v7  ;;  %v131_v51 = vld [vmem:[#allocation5 + $0x200] sm:$0xff]  ;;  %v65_v55 = vmax.f32 %v53_v49, 0.0 }
  0x42   :  { %310 = vmatmul.mubr.f32.vlgmr.msra.gmra.mxu1 %v57_v8  ;;  %505 = vmatpush3.msra.mxu0 %v146_v9  ;;  %v427_v0 = vld [vmem:[%s698_s2] ss:$0 sm:$0xff]  ;;  %s657_s2 = smov [#allocation7]  }
  0x43   :  { %558 = vmatpush3.msra.mxu1 %v146_v9  ;;  %506 = vmatprep.subr.mxu0 %v161_v10  ;;  %s414_s26 = sshll.u32 %s657_s2, 4  ;;  %s415_s26 = int_to_ptr.vmem [resolvable:$true] %s414_s26 }
  0x44   :  { %543 = vmatprep.subr.mxu1 %v161_v10  ;;  %507 = vmatpush3.msra.mxu0 %v145_v11  ;;  %s625_s27 = scalar_lea.vmem %s415_s26, 256  ;;  %p630_p11 = scmp.lt.s32.totalorder %s415_s26, %s415_s26 }
  0x45   :  { %559 = vmatpush3.msra.mxu1 %v145_v11  ;;  %508 = vmatprep.subr.mxu0 %v160_v12  ;;  %p626_p10 = scmp.ne.s32.totalorder %s415_s26, %s625_s27  ;;  %p631_p12 = scmp.lt.s32.totalorder %s625_s27, %s625_s27 }
  0x46   :  { %544 = vmatprep.subr.mxu1 %v160_v12  ;;  %509 = vmatpush3.msra.mxu0 %v144_v13 }
  0x47   :  { %560 = vmatpush3.msra.mxu1 %v144_v13  ;;  %510 = vmatprep.subr.mxu0 %v159_v14  ;;  %p632_p13 = por %p631_p12, %p630_p11 }
  0x48   :  { %545 = vmatprep.subr.mxu1 %v159_v14  ;;  %511 = vmatpush3.msra.mxu0 %v143_v15 }
  0x49   :  { %561 = vmatpush3.msra.mxu1 %v143_v15  ;;  %512 = vmatprep.subr.mxu0 %v158_v16  ;;  %p633_p0 = pnand %p632_p13, %p626_p10 }
  0x4a   :  { %546 = vmatprep.subr.mxu1 %v158_v16  ;;  %513 = vmatpush3.msra.mxu0 %v142_v17 }
  0x4b   :  { %562 = vmatpush3.msra.mxu1 %v142_v17  ;;  %514 = vmatprep.subr.mxu0 %v157_v18 }
  0x4c   :  { %547 = vmatprep.subr.mxu1 %v157_v18  ;;  %515 = vmatpush3.msra.mxu0 %v141_v19 }
  0x4d   :  { %563 = vmatpush3.msra.mxu1 %v141_v19  ;;  %516 = vmatprep.subr.mxu0 %v156_v20 }
  0x4e   :  { %548 = vmatprep.subr.mxu1 %v156_v20  ;;  %517 = vmatpush3.msra.mxu0 %v140_v21 }
  0x4f   :  { %564 = vmatpush3.msra.mxu1 %v140_v21  ;;  %518 = vmatprep.subr.mxu0 %v155_v22 }
  0x50   :  { %549 = vmatprep.subr.mxu1 %v155_v22  ;;  %519 = vmatpush3.msra.mxu0 %v139_v23 }
  0x51   :  { %565 = vmatpush3.msra.mxu1 %v139_v23  ;;  %520 = vmatprep.subr.mxu0 %v154_v24 }
  0x52   :  { %550 = vmatprep.subr.mxu1 %v154_v24  ;;  %521 = vmatpush3.msra.mxu0 %v138_v25 }
  0x53   :  { %566 = vmatpush3.msra.mxu1 %v138_v25  ;;  %522 = vmatprep.subr.mxu0 %v153_v26 }
  0x54   :  { %551 = vmatprep.subr.mxu1 %v153_v26  ;;  %523 = vmatpush3.msra.mxu0 %v137_v27 }
  0x55   :  { %567 = vmatpush3.msra.mxu1 %v137_v27  ;;  %524 = vmatprep.subr.mxu0 %v152_v28 }
  0x56   :  { %552 = vmatprep.subr.mxu1 %v152_v28  ;;  %525 = vmatpush3.msra.mxu0 %v136_v29 }
  0x57   :  { %568 = vmatpush3.msra.mxu1 %v136_v29  ;;  %526 = vmatprep.subr.mxu0 %v151_v31 }
  0x58   :  { %553 = vmatprep.subr.mxu1 %v151_v31  ;;  %527 = vmatpush3.msra.mxu0 %v135_v33 }
  0x59   :  { %569 = vmatpush3.msra.mxu1 %v135_v33  ;;  %528 = vmatprep.subr.mxu0 %v150_v34 }
  0x5a   :  { %554 = vmatprep.subr.mxu1 %v150_v34  ;;  %239 = vmatprep.mubr.f32.mxu0 %v62_v35 }
  0x5b   :  { %529 = vmatpush3.msra.mxu0 %v134_v37  ;;  %570 = vmatpush3.msra.mxu1 %v134_v37 }
  0x5c   :  { %240 = vmatmul.mubr.f32.gmra.mxu0 %v61_v38  ;;  %530 = vmatprep.subr.mxu0 %v149_v40 }
  0x5d   :  { %555 = vmatprep.subr.mxu1 %v149_v40  ;;  %314 = vmatprep.mubr.f32.mxu1 %v64_v41 }
  0x5e   :  { %531 = vmatpush3.msra.mxu0 %v133_v42  ;;  %571 = vmatpush3.msra.mxu1 %v133_v42 }
  0x5f   :  { %532 = vmatprep.subr.mxu0 %v148_v44  ;;  %315 = vmatmul.mubr.f32.gmra.mxu1 %v63_v43 }
  0x60   :  { %556 = vmatprep.subr.mxu1 %v148_v44  ;;  %533 = vmatpush3.msra.mxu0 %v132_v47 }
  0x61   :  { %572 = vmatpush3.msra.mxu1 %v132_v47  ;;  %534 = vmatprep.subr.mxu0 %v147_v50 }
  0x62   :  { %557 = vmatprep.subr.mxu1 %v147_v50  ;;  %535 = vmatpush3.msra.mxu0 %v131_v51 }
  0x63   :  { %573 = vmatpush3.msra.mxu1 %v131_v51  ;;  %384 = vmatprep.mubr.f32.mxu0 %v60_v52 }
  0x64   :  { %389 = vmatprep.mubr.f32.mxu1 %v66_v53  ;;  %385 = vmatmul.mubr.f32.vlgmr.msra.gmra.mxu0 %v59_v54 }
  0x65   :  { %390 = vmatmul.mubr.f32.vlgmr.msra.gmra.mxu1 %v65_v55 }
 0x100   :  { %v460_v56 = vpop.f32.mrf.mxu0 }
 0x102   :  { %v461_v57 = vpop.f32.mrf.mxu0  ;;  %v498_v58 = vpop.f32.mrf.mxu1 }
 0x103   :  { %v462_v62 = vadd.f32 %v461_v57, %v460_v56 }
 0x104   :  { %v499_v60 = vpop.f32.mrf.mxu1 }
 0x105   :  { %v237_v3 = vadd.f32 %v462_v62, %v427_v0  ;;  %v500_v4 = vadd.f32 %v499_v60, %v498_v58 }
 0x107   :  { %v312_v11 = vadd.f32 %v500_v4, %v237_v3 }
 0x11c   :  { %v463_v59 = vpop.f32.mrf.mxu0 }
 0x11e   :  { %v464_v61 = vpop.f32.mrf.mxu0 }
 0x11f   :  { %v501_v63 = vpop.f32.mrf.mxu1  ;;  %v465_v1 = vadd.f32 %v464_v61, %v463_v59 }
 0x121   :  { %v502_v2 = vpop.f32.mrf.mxu1  ;;  %v242_v7 = vadd.f32 %v465_v1, %v427_v0 }
 0x122   :  { %v503_v8 = vadd.f32 %v502_v2, %v501_v63 }
 0x124   :  { %v536_v5 = vpop.f32.mrf.mxu0  ;;  %v317_v14 = vadd.f32 %v503_v8, %v242_v7 }
 0x125   :  { %v539_v6 = vpop.f32.mrf.mxu1 }
 0x126   :  { %v537_v9 = vpop.f32.mrf.mxu0 }
 0x127   :  { %v540_v10 = vpop.f32.mrf.mxu1  ;;  %v538_v12 = vadd.f32 %v537_v9, %v536_v5 }
 0x128   :  { %v541_v13 = vadd.f32 %v540_v10, %v539_v6 }
 0x129   :  { %v387_v15 = vadd.f32 %v538_v12, %v312_v11 }
 0x12a   :  { %v392_v16 = vadd.f32 %v541_v13, %v317_v14 }
 0x12b   :  { %v395_v17 = vmul.f32 %v387_v15, %v387_v15 }
 0x12c   :  { %v396_v18 = vmul.f32 %v392_v16, %v392_v16 }
 0x12d   :  { %397 = vadd.xlane.f32.xlu0 %v395_v17 }
 0x131   :  { %399 = vadd.xlane.f32.xlu0 %v396_v18 }
 0x1b6   :  { %v398_v19 = vpop.xlane.xlu0 %397 }
 0x1b7   :  { %v401_v20 = vmax.f32 %v398_v19, 1e-24 }
 0x1b9   :  { %581 = vrsqrt.f32 %v401_v20 }
 0x1ba   :  { %v400_v21 = vpop.xlane.xlu0 %399 }
 0x1bb   :  { %v402_v22 = vmax.f32 %v400_v21, 1e-24 }
 0x1bd   :  { %583 = vrsqrt.f32 %v402_v22 }
 0x1c6   :  { %v582_v23 = vpop.eup %581 }
 0x1c7   :  { %v405_v24 = vmul.f32 %v582_v23, %v387_v15 }
 0x1c9   :  { %407 = vst [vmem:[#allocation7] sm:$0xff] %v405_v24 }
 0x1ca   :  { %v584_v25 = vpop.eup %583 }
 0x1cb   :  { %v406_v26 = vmul.f32 %v584_v25, %v392_v16 }
 0x1cd   :  { %408 = vst [vmem:[#allocation7 + $0x8] sm:$0xff] %v406_v26 }
 0x1ce   :  { %636 = shalt.err (!%p633_p0)
}
 0x1cf   :  { %420 = dma.vmem_to_hbm [thread:$0]  %s415_s26, 256, %s699_s3, [#allocation4], %s655_s22, %s655_s22, %s656_s23  }
 0x1d0   :  { %649 = dma.done.wait [#allocation4], 256  }
 0x1d1   :  { %650 = vsyncadd [#allocation4], 4294967040 }
 0x1d2   :  { %424 = vsyncpa [#allocation3], 1 }
 0x1d3   :  { %425 = vsyncpa [#allocation6], 1 }
 0x1d4   :  { %426 = vsyncpa [#allocation4], 1 }

</bundles_post_ra>
